<compile_context>
chip_gen: v7x
topology: tpu7x:2x2x1
jax: 0.10.0
libtpu: 0.0.40
codegen_flags: <defaults>
</compile_context>

<pallas_src>
import math
import jax
import jax.numpy as jnp
from jax import lax
from jax.experimental import pallas as pl
from jax.experimental.pallas import tpu as pltpu


_VMEM_LIMIT_BYTES = 48 * 1024 * 1024   # > 16/32 MiB scoped defaults, < v7x 64 MiB physical
_VMEM_BUDGET = 36 * 1024 * 1024        # working-set target; leaves headroom for temporaries


def _round_up(x, m):
    return (x + m - 1) // m * m


def _choose_tile(dim_pad, preferred):
    for t in preferred:
        if t <= dim_pad and dim_pad % t == 0:
            return t
    return dim_pad


# ---------------------------------------------------------------------------
# Path A (fused): softmax(W) + matmul in a single pallas_call.
# Each weight tile is visited exactly once (single batch tile), so the in-kernel
# softmax costs nothing extra and we delete one dispatch + the sm HBM round-trip.
# ---------------------------------------------------------------------------
def fused_softmax_matmul_kernel(x_ref, w_ref, o_ref):
    # x_ref: [B_pad, D] bf16 (resident, constant block index)
    # w_ref: [TF, D] f32 ; o_ref: [B_pad, TF] f32
    w = w_ref[...]
    w_max = jnp.max(w, axis=1, keepdims=True)
    e = jnp.exp(w - w_max)                                                  # f32 softmax math
    inv = pl.reciprocal(jnp.sum(e, axis=1, keepdims=True), approx=True)     # EUP vrcp slot
    sm = (e * inv).astype(jnp.bfloat16)                                     # bf16 MXU operand
    o_ref[...] = lax.dot_general(
        x_ref[...], sm,
        dimension_numbers=(((1,), (1,)), ((), ())),   # contract D with D: no XLU transpose
        preferred_element_type=jnp.float32,
    )


# ---------------------------------------------------------------------------
# Path B (unfused, larger problems): hoisted row-softmax + K-tiled matmul.
# ---------------------------------------------------------------------------
def softmax_rows_kernel(w_ref, sm_ref):
    # w_ref: [rows, D] f32 ; sm_ref: [rows, D] bf16
    w = w_ref[...]
    w_max = jnp.max(w, axis=1, keepdims=True)
    e = jnp.exp(w - w_max)
    inv = pl.reciprocal(jnp.sum(e, axis=1, keepdims=True), approx=True)
    sm_ref[...] = (e * inv).astype(sm_ref.dtype)


def matmul_kernel(x_ref, sm_ref, o_ref, acc_ref):
    # grid = (outer, inner, k); k ("arbitrary", last) is the contraction axis.
    # x_ref: [TB, TK] bf16 ; sm_ref: [TF, TK] bf16 ; o_ref: [TB, TF] f32 ; acc_ref: f32 scratch
    @pl.when(pl.program_id(2) == 0)
    def _init():
        acc_ref[...] = jnp.zeros_like(acc_ref)

    acc_ref[...] += lax.dot_general(
        x_ref[...], sm_ref[...],
        dimension_numbers=(((1,), (1,)), ((), ())),
        preferred_element_type=jnp.float32,
    )

    @pl.when(pl.program_id(2) == pl.num_programs(2) - 1)
    def _store():
        o_ref[...] = acc_ref[...].astype(o_ref.dtype)


def mlp_forward(inputbow, weight):
    """features = inputbow @ softmax(weight, axis=1).T  (matches the torch forward)."""
    B, D = inputbow.shape
    F, D2 = weight.shape
    assert D == D2

    D_pad = _round_up(D, 128)
    F_pad = _round_up(F, 128)            # lane-dense output: unmasked vst
    B_pad = _round_up(B, 16)             # bf16 LHS: 16-row sublane packing

    # Padding: -1e30 in W's padded D columns (exp -> 0, no softmax perturbation),
    # zero elsewhere; padded F rows / B rows are sliced off at the end.
    w_p = weight.astype(jnp.float32)
    if D_pad > D:
        w_p = jnp.pad(w_p, ((0, 0), (0, D_pad - D)), constant_values=-1e30)
    if F_pad > F:
        w_p = jnp.pad(w_p, ((0, F_pad - F), (0, 0)))
    # bf16 cast done in the wrapper (not in-kernel): halves x's DMA bytes.
    x_p = inputbow.astype(jnp.bfloat16)
    if D_pad > D or B_pad > B:
        x_p = jnp.pad(x_p, ((0, B_pad - B), (0, D_pad - D)))

    # ---- Path A: fused softmax+matmul (single batch tile, full-D blocks) ----
    def _fused_bytes(tf):
        return (2 * B_pad * D_pad * 2        # x bf16, double-buffered
                + 2 * tf * D_pad * 4         # w f32, double-buffered
                + 2 * B_pad * tf * 4         # out f32, double-buffered
                + 2 * tf * D_pad * 4)        # softmax temporaries

    # 256-wide tiles feed the 256x256 MXU on v6e/v7x; 128 is equally fine on v5e (4x128 MXU).
    tile_f_fused = _choose_tile(F_pad, (256, 128))
    use_fused = (B_pad <= 512) and (_fused_bytes(tile_f_fused) <= _VMEM_BUDGET)

    if use_fused:
        out_pad = pl.pallas_call(
            fused_softmax_matmul_kernel,
            out_shape=jax.ShapeDtypeStruct((B_pad, F_pad), jnp.float32),
            grid_spec=pltpu.PrefetchScalarGridSpec(
                num_scalar_prefetch=0,
                grid=(F_pad // tile_f_fused,),
                in_specs=[
                    pl.BlockSpec((B_pad, D_pad), lambda j: (0, 0)),          # x resident
                    pl.BlockSpec((tile_f_fused, D_pad), lambda j: (j, 0)),   # each W tile visited once
                ],
                out_specs=pl.BlockSpec((B_pad, tile_f_fused), lambda j: (0, j)),
            ),
            compiler_params=pltpu.CompilerParams(
                dimension_semantics=("parallel",),
                vmem_limit_bytes=_VMEM_LIMIT_BYTES,
            ),
        )(x_p, w_p)
        return out_pad[:B, :F]

    # ---- Path B: hoisted softmax (computed once) + K-tiled matmul ----
    # 1) softmax(W): largest row block that fits VMEM (amortizes ~0.35us/step overhead).
    def _softmax_bytes(rows):
        return 2 * rows * D_pad * 4 + 2 * rows * D_pad * 2 + rows * D_pad * 4
    sm_rows = _choose_tile(F_pad, (512, 256, 128))
    while sm_rows > 8 and _softmax_bytes(sm_rows) > _VMEM_BUDGET:
        sm_rows = max(8, sm_rows // 2)
    # TODO(synk): for input_dim so large that even an 8-row block of W exceeds VMEM,
    # the row softmax would need a two-pass/online formulation over D chunks.

    sm = pl.pallas_call(
        softmax_rows_kernel,
        out_shape=jax.ShapeDtypeStruct((F_pad, D_pad), jnp.bfloat16),
        grid_spec=pltpu.PrefetchScalarGridSpec(
            num_scalar_prefetch=0,
            grid=(F_pad // sm_rows,),
            in_specs=[pl.BlockSpec((sm_rows, D_pad), lambda i: (i, 0))],
            out_specs=pl.BlockSpec((sm_rows, D_pad), lambda i: (i, 0)),
        ),
        compiler_params=pltpu.CompilerParams(
            dimension_semantics=("parallel",),
            vmem_limit_bytes=_VMEM_LIMIT_BYTES,
        ),
    )(w_p)

    # 2) K-tiled matmul: VMEM footprint capped independent of input_dim.
    def _mm_bytes(tb, tf, tk):
        return (2 * tb * tk * 2      # x bf16, double-buffered
                + 2 * tf * tk * 2    # sm bf16, double-buffered
                + 2 * tb * tf * 4    # out f32, double-buffered
                + tb * tf * 4)       # f32 accumulator scratch

    tb_pref = _choose_tile(B_pad, (256, 128))
    tf_candidates = []
    if F_pad <= 1024:
        tf_candidates.append(F_pad)   # fully-resident sm (constant block index -> DMA'd once)
    tf_candidates += [t for t in (256, 128) if t <= F_pad and F_pad % t == 0]

    tile_b = tile_f = tile_k = None
    for tf in tf_candidates:
        m = D_pad // 128
        for d in range(m, 0, -1):
            if m % d == 0 and _mm_bytes(tb_pref, tf, 128 * d) <= _VMEM_BUDGET:
                tile_b, tile_f, tile_k = tb_pref, tf, 128 * d
                break
        if tile_k is not None:
            break
    if tile_k is None:
        tile_b, tile_f, tile_k = tb_pref, 128, 128   # minimal regular tiles

    nB, nF, nK = B_pad // tile_b, F_pad // tile_f, D_pad // tile_k
    x_bytes = B_pad * D_pad * 2
    sm_bytes = F_pad * D_pad * 2
    # The operand tied to the inner (second) axis is fully re-streamed once per outer tile;
    # pick the ordering with less total HBM traffic.
    batch_outer = (x_bytes + nB * sm_bytes) <= (sm_bytes + nF * x_bytes)

    if batch_outer:
        grid = (nB, nF, nK)
        x_spec = pl.BlockSpec((tile_b, tile_k), lambda i, j, k: (i, k))
        s_spec = pl.BlockSpec((tile_f, tile_k), lambda i, j, k: (j, k))
        o_spec = pl.BlockSpec((tile_b, tile_f), lambda i, j, k: (i, j))
    else:
        grid = (nF, nB, nK)
        x_spec = pl.BlockSpec((tile_b, tile_k), lambda j, i, k: (i, k))
        s_spec = pl.BlockSpec((tile_f, tile_k), lambda j, i, k: (j, k))
        o_spec = pl.BlockSpec((tile_b, tile_f), lambda j, i, k: (i, j))

    out_pad = pl.pallas_call(
        matmul_kernel,
        out_shape=jax.ShapeDtypeStruct((B_pad, F_pad), jnp.float32),
        grid_spec=pltpu.PrefetchScalarGridSpec(
            num_scalar_prefetch=0,
            grid=grid,
            in_specs=[x_spec, s_spec],
            out_specs=o_spec,
            scratch_shapes=[pltpu.VMEM((tile_b, tile_f), jnp.float32)],
        ),
        compiler_params=pltpu.CompilerParams(
            dimension_semantics=("parallel", "parallel", "arbitrary"),
            vmem_limit_bytes=_VMEM_LIMIT_BYTES,
        ),
    )(x_p, sm)

    return out_pad[:B, :F]


def xavier_uniform(key, shape):
    # matches torch.nn.init.xavier_uniform_ for a Linear weight [out, in]
    fan_out, fan_in = shape
    bound = math.sqrt(6.0 / (fan_in + fan_out))
    return jax.random.uniform(key, shape, jnp.float32, -bound, bound)


if __name__ == "__main__":
    # small, hardware-friendly sizes consistent with the module's forward
    batch = 8
    input_dim = 128      # flags.input_dim
    num_features = 32    # flags.num_features
    z_dim = 16           # flags.z_dim

    key = jax.random.PRNGKey(0)
    k_x, k_z, k_w1, k_w4 = jax.random.split(key, 4)

    # deterministic parameter init (xavier uniform weights, zero biases)
    lin1_w = xavier_uniform(k_w1, (num_features, input_dim))
    lin1_b = jnp.zeros((num_features,), jnp.float32)          # unused in forward
    lin4_w = xavier_uniform(k_w4, (1, z_dim))                 # unused in forward
    lin4_b = jnp.zeros((1,), jnp.float32)                     # unused in forward

    inputbow = jax.random.normal(k_x, (batch, input_dim), jnp.float32)
    vaez = jax.random.normal(k_z, (batch, z_dim), jnp.float32)  # unused by forward

    fwd = jax.jit(mlp_forward)
    out = fwd(inputbow, lin1_w)
    jax.block_until_ready(out)

    # reference check in plain JAX (f32); kernel uses bf16 MXU operands + approx
    # reciprocal, so tolerance is relaxed accordingly.
    ref = inputbow @ jax.nn.softmax(lin1_w, axis=1).T
    assert out.shape == (batch, num_features)
    assert jnp.allclose(out, ref, atol=1e-2, rtol=1e-2), float(jnp.max(jnp.abs(out - ref)))

    print("KERNEL_OK")
</pallas_src>

<mosaic_0001>
module attributes {stable_mosaic.version = 11 : i64} {
  func.func @fused_softmax_matmul_kernel(%arg0: i32, %arg1: memref<16x128xbf16, #tpu.memory_space<vmem>>, %arg2: memref<128x128xf32, #tpu.memory_space<vmem>>, %arg3: memref<16x128xf32, #tpu.memory_space<vmem>>) attributes {dimension_semantics = [#tpu.dimension_semantics<parallel>], iteration_bounds = array<i64: 1>, scalar_prefetch = 0 : i64, scratch_operands = 0 : i64, tpu.core_type = #tpu.core_type<tc>, window_params = [{pipeline_mode = #tpu.pipeline_mode<synchronous>, transform_indices = @transform_0, window_bounds = array<i64: 16, 128>}, {transform_indices = @transform_1, window_bounds = array<i64: 128, 128>}, {transform_indices = @transform_2, window_bounds = array<i64: 16, 128>}]} {
    %c0 = arith.constant 0 : index
    %c0_0 = arith.constant 0 : index
    %0 = vector.load %arg2[%c0, %c0_0] : memref<128x128xf32, #tpu.memory_space<vmem>>, vector<128x128xf32>
    %cst = arith.constant dense<0xFF800000> : vector<128xf32>
    %1 = vector.multi_reduction <maximumf>, %0, %cst [1] : vector<128x128xf32> to vector<128xf32>
    %2 = vector.shape_cast %1 : vector<128xf32> to vector<128x1xf32>
    %3 = vector.broadcast %2 : vector<128x1xf32> to vector<128x128xf32>
    %4 = arith.subf %0, %3 : vector<128x128xf32>
    %5 = math.exp %4 : vector<128x128xf32>
    %cst_1 = arith.constant dense<0.000000e+00> : vector<128xf32>
    %6 = vector.multi_reduction <add>, %5, %cst_1 [1] : vector<128x128xf32> to vector<128xf32>
    %7 = vector.shape_cast %6 : vector<128xf32> to vector<128x1xf32>
    %8 = tpu.reciprocal %7 {approx = true} : vector<128x1xf32> -> vector<128x1xf32>
    %9 = vector.broadcast %8 : vector<128x1xf32> to vector<128x128xf32>
    %10 = arith.mulf %5, %9 : vector<128x128xf32>
    %11 = arith.truncf %10 : vector<128x128xf32> to vector<128x128xbf16>
    %c0_2 = arith.constant 0 : index
    %c0_3 = arith.constant 0 : index
    %12 = vector.load %arg1[%c0_2, %c0_3] : memref<16x128xbf16, #tpu.memory_space<vmem>>, vector<16x128xbf16>
    %cst_4 = arith.constant dense<0.000000e+00> : vector<16x128xf32>
    %13 = tpu.matmul %12, %11, %cst_4 {dimension_numbers = #tpu.dot_dimension_numbers<[1], [1], [0], [0], [0, 0, 1, 0], [], []>} : vector<16x128xbf16>, vector<128x128xbf16>, vector<16x128xf32> -> vector<16x128xf32>
    %c0_5 = arith.constant 0 : index
    %c0_6 = arith.constant 0 : index
    %14 = vector.load %arg3[%c0_5, %c0_6] : memref<16x128xf32, #tpu.memory_space<vmem>>, vector<16x128xf32>
    tpu.vector_store %arg3[%c0_5, %c0_6], %13 {strides = array<i32>} : memref<16x128xf32, #tpu.memory_space<vmem>>, vector<16x128xf32>,
    return
  }
  func.func @transform_0(%arg0: i32) -> (i32, i32) {
    %c0_i32 = arith.constant 0 : i32
    %c0_i32_0 = arith.constant 0 : i32
    %c0_i32_1 = arith.constant 0 : i32
    return %c0_i32, %c0_i32_0 : i32, i32
  }
  func.func @transform_1(%arg0: i32) -> (i32, i32) {
    %c0_i32 = arith.constant 0 : i32
    %c0_i32_0 = arith.constant 0 : i32
    return %arg0, %c0_i32 : i32, i32
  }
  func.func @transform_2(%arg0: i32) -> (i32, i32) {
    %c0_i32 = arith.constant 0 : i32
    %c0_i32_0 = arith.constant 0 : i32
    return %c0_i32, %arg0 : i32, i32
  }
}

</mosaic_0001>

<bundles_post_ra>
// kernel: mlp_forward.1
= control target key start
LH: loop header
LB: loop body
LE: loop exit
PB: predicated region body
PF: predicated region fallthrough
CT: control target
= control target key end

     0   :  { %vm333_vm0 = vmmov 0   ;;  %s503_s1 = inlined_call_operand.vmem [shape: f32[128,128], index: 1, kind: input, shape index: {}]   ;;  %s504_s0 = inlined_call_operand.vmem [shape: bf16[16,128], index: 0, kind: input, shape index: {}]   ;;  %s505_s2 = inlined_call_operand.vmem [shape: f32[16,128], index: 2, kind: output, shape index: {}]  }
   0x1   :  { %v12_v0 = vld [vmem:[%s503_s1] sm:$0xff]  ;;  %v14_v1 = vld [vmem:[%s503_s1 + $0x10] sm:$0xff]  ;;  %v13_v2 = vld [vmem:[%s503_s1 + $0x8] sm:$0xff] }
   0x2   :  { %28 = vmax.xlane.f32.xlu0 %v12_v0  ;;  %32 = vmax.xlane.f32.xlu1 %v14_v1  ;;  %v15_v3 = vld [vmem:[%s503_s1 + $0x18] sm:$0xff]  ;;  %v16_v4 = vld [vmem:[%s503_s1 + $0x20] sm:$0xff]  ;;  %v17_v5 = vld [vmem:[%s503_s1 + $0x28] sm:$0xff] }
   0x3   :  { %v18_v6 = vld [vmem:[%s503_s1 + $0x30] sm:$0xff]  ;;  %v19_v7 = vld [vmem:[%s503_s1 + $0x38] sm:$0xff]  ;;  %v20_v8 = vld [vmem:[%s503_s1 + $0x40] sm:$0xff] }
   0x4   :  { %v21_v9 = vld [vmem:[%s503_s1 + $0x48] sm:$0xff]  ;;  %v382_v10 = vld [vmem:[%s503_s1 + $0x50] sm:$0xff]  ;;  %v387_v11 = vld [vmem:[%s503_s1 + $0x58] sm:$0xff] }
   0x5   :  { %v394_v12 = vld [vmem:[%s503_s1 + $0x60] sm:$0xff]  ;;  %v399_v13 = vld [vmem:[%s503_s1 + $0x68] sm:$0xff]  ;;  %v406_v14 = vld [vmem:[%s503_s1 + $0x70] sm:$0xff] }
   0x6   :  { %30 = vmax.xlane.f32.xlu0 %v13_v2  ;;  %34 = vmax.xlane.f32.xlu1 %v15_v3  ;;  %v411_v15 = vld [vmem:[%s503_s1 + $0x78] sm:$0xff] }
   0xa   :  { %36 = vmax.xlane.f32.xlu0 %v16_v4  ;;  %38 = vmax.xlane.f32.xlu1 %v17_v5 }
   0xe   :  { %40 = vmax.xlane.f32.xlu0 %v18_v6  ;;  %42 = vmax.xlane.f32.xlu1 %v19_v7 }
  0x12   :  { %44 = vmax.xlane.f32.xlu0 %v20_v8  ;;  %46 = vmax.xlane.f32.xlu1 %v21_v9 }
  0x16   :  { %48 = vmax.xlane.f32.xlu0 %v382_v10  ;;  %50 = vmax.xlane.f32.xlu1 %v387_v11 }
  0x1a   :  { %52 = vmax.xlane.f32.xlu0 %v394_v12  ;;  %54 = vmax.xlane.f32.xlu1 %v399_v13 }
  0x1e   :  { %56 = vmax.xlane.f32.xlu0 %v406_v14  ;;  %58 = vmax.xlane.f32.xlu1 %v411_v15 }
  0x8f   :  { %v29_v16 = vpop.xlane.xlu0 %28  ;;  %v33_v17 = vpop.xlane.xlu1 %32 }
  0x90   :  { %v60_v18 = vsub.f32 %v12_v0, %v29_v16  ;;  %v62_v19 = vsub.f32 %v14_v1, %v33_v17  ;;  %v332_v16 = vmov 0.0  }
  0x91   :  { %245 = vmatprep.subr.bf16.mxu0 %v332_v16  ;;  %261 = vmatprep.mubr.msk.bf16.mxu0 %vm333_vm0, %v332_v16 }
  0x92   :  { %v76_v20 = vmul.f32 1.442695, %v60_v18  ;;  %v80_v21 = vmul.f32 1.442695, %v62_v19 }
  0x93   :  { %v31_v22 = vpop.xlane.xlu0 %30  ;;  %v35_v23 = vpop.xlane.xlu1 %34 }
  0x94   :  { %268 = vpow2.f32 %v76_v20  ;;  %v61_v24 = vsub.f32 %v13_v2, %v31_v22  ;;  %v63_v25 = vsub.f32 %v15_v3, %v35_v23 }
  0x95   :  { %270 = vpow2.f32 %v80_v21 }
  0x96   :  { %v78_v26 = vmul.f32 1.442695, %v61_v24  ;;  %v82_v27 = vmul.f32 1.442695, %v63_v25 }
  0x97   :  { %v37_v28 = vpop.xlane.xlu0 %36  ;;  %v39_v29 = vpop.xlane.xlu1 %38 }
  0x98   :  { %272 = vpow2.f32 %v78_v26  ;;  %v64_v30 = vsub.f32 %v16_v4, %v37_v28  ;;  %v65_v31 = vsub.f32 %v17_v5, %v39_v29 }
  0x99   :  { %274 = vpow2.f32 %v82_v27 }
  0x9a   :  { %v84_v32 = vmul.f32 1.442695, %v64_v30  ;;  %v86_v33 = vmul.f32 1.442695, %v65_v31 }
  0x9b   :  { %v41_v34 = vpop.xlane.xlu0 %40  ;;  %v43_v35 = vpop.xlane.xlu1 %42 }
  0x9c   :  { %276 = vpow2.f32 %v84_v32  ;;  %v66_v36 = vsub.f32 %v18_v6, %v41_v34  ;;  %v67_v37 = vsub.f32 %v19_v7, %v43_v35 }
  0x9d   :  { %278 = vpow2.f32 %v86_v33 }
  0x9e   :  { %v415_v38 = vpop.eup %268  ;;  %v88_v39 = vmul.f32 1.442695, %v66_v36  ;;  %v90_v40 = vmul.f32 1.442695, %v67_v37 }
  0x9f   :  { %108 = vadd.xlane.f32.xlu0 %v415_v38  ;;  %v45_v41 = vpop.xlane.xlu0 %44  ;;  %v47_v42 = vpop.xlane.xlu1 %46 }
  0xa0   :  { %v418_v43 = vpop.eup %270  ;;  %280 = vpow2.f32 %v88_v39  ;;  %v68_v44 = vsub.f32 %v20_v8, %v45_v41  ;;  %v69_v45 = vsub.f32 %v21_v9, %v47_v42 }
  0xa1   :  { %282 = vpow2.f32 %v90_v40 }
  0xa2   :  { %v420_v46 = vpop.eup %272  ;;  %v92_v47 = vmul.f32 1.442695, %v68_v44  ;;  %v94_v48 = vmul.f32 1.442695, %v69_v45 }
  0xa3   :  { %112 = vadd.xlane.f32.xlu0 %v418_v43  ;;  %110 = vadd.xlane.f32.xlu1 %v420_v46  ;;  %v49_v49 = vpop.xlane.xlu0 %48  ;;  %v51_v50 = vpop.xlane.xlu1 %50 }
  0xa4   :  { %v424_v51 = vpop.eup %274  ;;  %284 = vpow2.f32 %v92_v47  ;;  %v70_v52 = vsub.f32 %v382_v10, %v49_v49  ;;  %v71_v53 = vsub.f32 %v387_v11, %v51_v50 }
  0xa5   :  { %286 = vpow2.f32 %v94_v48 }
  0xa6   :  { %v428_v54 = vpop.eup %276  ;;  %v96_v55 = vmul.f32 1.442695, %v70_v52  ;;  %v98_v56 = vmul.f32 1.442695, %v71_v53 }
  0xa7   :  { %114 = vadd.xlane.f32.xlu1 %v424_v51  ;;  %116 = vadd.xlane.f32.xlu0 %v428_v54  ;;  %v53_v57 = vpop.xlane.xlu0 %52  ;;  %v55_v58 = vpop.xlane.xlu1 %54 }
  0xa8   :  { %v432_v59 = vpop.eup %278  ;;  %288 = vpow2.f32 %v96_v55  ;;  %v72_v60 = vsub.f32 %v394_v12, %v53_v57  ;;  %v73_v61 = vsub.f32 %v399_v13, %v55_v58 }
  0xa9   :  { %290 = vpow2.f32 %v98_v56 }
  0xaa   :  { %v436_v62 = vpop.eup %280  ;;  %v100_v63 = vmul.f32 1.442695, %v72_v60  ;;  %v102_v0 = vmul.f32 1.442695, %v73_v61 }
  0xab   :  { %118 = vadd.xlane.f32.xlu1 %v432_v59  ;;  %120 = vadd.xlane.f32.xlu0 %v436_v62  ;;  %v57_v1 = vpop.xlane.xlu0 %56  ;;  %v59_v2 = vpop.xlane.xlu1 %58 }
  0xac   :  { %v440_v3 = vpop.eup %282  ;;  %292 = vpow2.f32 %v100_v63  ;;  %v74_v4 = vsub.f32 %v406_v14, %v57_v1  ;;  %v75_v5 = vsub.f32 %v411_v15, %v59_v2 }
  0xad   :  { %294 = vpow2.f32 %v102_v0 }
  0xae   :  { %v444_v6 = vpop.eup %284  ;;  %v104_v7 = vmul.f32 1.442695, %v74_v4  ;;  %v106_v8 = vmul.f32 1.442695, %v75_v5 }
  0xaf   :  { %122 = vadd.xlane.f32.xlu1 %v440_v3  ;;  %124 = vadd.xlane.f32.xlu0 %v444_v6  ;;  %v448_v9 = vpop.eup %286 }
  0xb0   :  { %296 = vpow2.f32 %v104_v7 }
  0xb1   :  { %298 = vpow2.f32 %v106_v8 }
  0xb2   :  { %v450_v10 = vpop.eup %288 }
  0xb3   :  { %126 = vadd.xlane.f32.xlu1 %v448_v9  ;;  %128 = vadd.xlane.f32.xlu0 %v450_v10  ;;  %v454_v11 = vpop.eup %290 }
  0xb6   :  { %v456_v12 = vpop.eup %292 }
  0xb7   :  { %130 = vadd.xlane.f32.xlu1 %v454_v11  ;;  %132 = vadd.xlane.f32.xlu0 %v456_v12  ;;  %v460_v13 = vpop.eup %294 }
  0xba   :  { %v462_v14 = vpop.eup %296 }
  0xbb   :  { %134 = vadd.xlane.f32.xlu1 %v460_v13  ;;  %136 = vadd.xlane.f32.xlu0 %v462_v14  ;;  %v466_v15 = vpop.eup %298 }
  0xbf   :  { %138 = vadd.xlane.f32.xlu1 %v466_v15 }
 0x12c   :  { %v109_v17 = vpop.xlane.xlu0 %108 }
 0x12d   :  { %300 = vrcp.f32 %v109_v17 }
 0x130   :  { %v111_v18 = vpop.xlane.xlu1 %110  ;;  %v113_v19 = vpop.xlane.xlu0 %112 }
 0x131   :  { %302 = vrcp.f32 %v111_v18 }
 0x134   :  { %v115_v20 = vpop.xlane.xlu1 %114  ;;  %v117_v24 = vpop.xlane.xlu0 %116 }
 0x135   :  { %304 = vrcp.f32 %v115_v20 }
 0x136   :  { %306 = vrcp.f32 %v113_v19 }
 0x137   :  { %v301_v21 = vpop.eup %300 }
 0x138   :  { %v119_v22 = vpop.xlane.xlu1 %118  ;;  %v156_v25 = vmul.f32 %v301_v21, %v415_v38  ;;  %v121_v32 = vpop.xlane.xlu0 %120 }
 0x139   :  { %308 = vrcp.f32 %v119_v22 }
 0x13a   :  { %310 = vrcp.f32 %v117_v24 }
 0x13b   :  { %v303_v23 = vpop.eup %302 }
 0x13c   :  { %v157_v26 = vmul.f32 %v303_v23, %v420_v46  ;;  %v123_v30 = vpop.xlane.xlu1 %122  ;;  %v125_v39 = vpop.xlane.xlu0 %124 }
 0x13d   :  { %312 = vrcp.f32 %v123_v30 }
 0x13e   :  { %v172_v27 = vpack.c.bf16 %v157_v26, %v156_v25  ;;  %314 = vrcp.f32 %v121_v32 }
 0x13f   :  { %v305_v28 = vpop.eup %304 }
 0x140   :  { %246 = vmatpush3.bf16.xpose.msra.mxu0 %v172_v27  ;;  %v307_v29 = vpop.eup %306  ;;  %v159_v31 = vmul.f32 %v305_v28, %v424_v51  ;;  %v127_v37 = vpop.xlane.xlu1 %126 }
 0x141   :  { %247 = vmatprep.subr.bf16.mxu0 %v332_v16  ;;  %v158_v33 = vmul.f32 %v307_v29, %v418_v43  ;;  %316 = vrcp.f32 %v127_v37  ;;  %v129_v46 = vpop.xlane.xlu0 %128 }
 0x142   :  { %318 = vrcp.f32 %v125_v39 }
 0x143   :  { %v173_v34 = vpack.c.bf16 %v159_v31, %v158_v33  ;;  %v309_v35 = vpop.eup %308 }
 0x144   :  { %v311_v36 = vpop.eup %310  ;;  %v161_v38 = vmul.f32 %v309_v35, %v432_v59  ;;  %v131_v44 = vpop.xlane.xlu1 %130 }
 0x145   :  { %v160_v40 = vmul.f32 %v311_v36, %v428_v54  ;;  %320 = vrcp.f32 %v131_v44  ;;  %v133_v53 = vpop.xlane.xlu0 %132 }
 0x146   :  { %322 = vrcp.f32 %v129_v46 }
 0x147   :  { %v174_v41 = vpack.c.bf16 %v161_v38, %v160_v40  ;;  %v313_v42 = vpop.eup %312 }
 0x148   :  { %248 = vmatpush3.bf16.xpose.msra.mxu0 %v173_v34  ;;  %v315_v43 = vpop.eup %314  ;;  %v163_v45 = vmul.f32 %v313_v42, %v440_v3  ;;  %v135_v51 = vpop.xlane.xlu1 %134 }
 0x149   :  { %249 = vmatprep.subr.bf16.mxu0 %v332_v16  ;;  %v162_v47 = vmul.f32 %v315_v43, %v436_v62  ;;  %324 = vrcp.f32 %v135_v51  ;;  %v137_v60 = vpop.xlane.xlu0 %136 }
 0x14a   :  { %326 = vrcp.f32 %v133_v53 }
 0x14b   :  { %v175_v48 = vpack.c.bf16 %v163_v45, %v162_v47  ;;  %v317_v49 = vpop.eup %316 }
 0x14c   :  { %v319_v50 = vpop.eup %318  ;;  %v165_v52 = vmul.f32 %v317_v49, %v448_v9  ;;  %v139_v58 = vpop.xlane.xlu1 %138  ;;  %v267_v9 = vld [vmem:[%s504_s0] sm:$0xff]  }
 0x14d   :  { %v164_v54 = vmul.f32 %v319_v50, %v444_v6  ;;  %328 = vrcp.f32 %v139_v58 }
 0x14e   :  { %330 = vrcp.f32 %v137_v60 }
 0x14f   :  { %v176_v55 = vpack.c.bf16 %v165_v52, %v164_v54  ;;  %v321_v56 = vpop.eup %320 }
 0x150   :  { %250 = vmatpush3.bf16.xpose.msra.mxu0 %v174_v41  ;;  %v323_v57 = vpop.eup %322  ;;  %v167_v59 = vmul.f32 %v321_v56, %v454_v11 }
 0x151   :  { %251 = vmatprep.subr.bf16.mxu0 %v332_v16  ;;  %v166_v61 = vmul.f32 %v323_v57, %v450_v10 }
 0x153   :  { %v177_v62 = vpack.c.bf16 %v167_v59, %v166_v61  ;;  %v325_v63 = vpop.eup %324 }
 0x154   :  { %v327_v0 = vpop.eup %326  ;;  %v169_v1 = vmul.f32 %v325_v63, %v460_v13 }
 0x155   :  { %v168_v2 = vmul.f32 %v327_v0, %v456_v12 }
 0x157   :  { %v178_v3 = vpack.c.bf16 %v169_v1, %v168_v2  ;;  %v329_v4 = vpop.eup %328 }
 0x158   :  { %252 = vmatpush3.bf16.xpose.msra.mxu0 %v175_v48  ;;  %v331_v5 = vpop.eup %330  ;;  %v171_v6 = vmul.f32 %v329_v4, %v466_v15 }
 0x159   :  { %253 = vmatprep.subr.bf16.mxu0 %v332_v16  ;;  %v170_v7 = vmul.f32 %v331_v5, %v462_v14 }
 0x15b   :  { %v179_v8 = vpack.c.bf16 %v171_v6, %v170_v7 }
 0x160   :  { %254 = vmatpush3.bf16.xpose.msra.mxu0 %v176_v55 }
 0x161   :  { %255 = vmatprep.subr.bf16.mxu0 %v332_v16 }
 0x168   :  { %256 = vmatpush3.bf16.xpose.msra.mxu0 %v177_v62 }
 0x169   :  { %257 = vmatprep.subr.bf16.mxu0 %v332_v16 }
 0x170   :  { %258 = vmatpush3.bf16.xpose.msra.mxu0 %v178_v3 }
 0x171   :  { %259 = vmatprep.subr.bf16.mxu0 %v332_v16 }
 0x178   :  { %260 = vmatpush3.bf16.xpose.msra.mxu0 %v179_v8 }
 0x17f   :  { %262 = vmatmul.mubr.bf16.vlgmr.msra.gmra.mrb[0].mxu0 %v267_v9 }
 0x252   :  { %v222_v10 = vpop.f32.mrb[0].mxu0 }
 0x253   :  { %229 = vst [vmem:[%s505_s2] sm:$0xff] %v222_v10  ;;  %v263_v11 = vpop.f32.mrb[1].mxu0 }
 0x254   :  { %v225_v12 = vpop.f32.mrb[2].mxu0 }
 0x255   :  { %230 = vst [vmem:[%s505_s2 + $0x8] sm:$0xff] %v225_v12  ;;  %v264_v13 = vpop.f32.mrb[3].mxu0 }

</bundles_post_ra>
